<compile_context>
chip_gen: v7x
topology: tpu7x:2x2x1
jax: 0.10.0
libtpu: 0.0.40
codegen_flags: <defaults>
</compile_context>

<pallas_src>
import functools

import jax
import jax.numpy as jnp
from jax.experimental import pallas as pl
from jax.experimental.pallas import tpu as pltpu


def _smooth_ce_kernel(logits_ref, labels_ref, out_ref,
                      m_sc, se_sc, sx_sc, xl_sc, *,
                      confidence, smoothing, vocab_size, tile_vocab):
    k = pl.program_id(1)

    @pl.when(k == 0)
    def _init():
        m_sc[...] = jnp.full_like(m_sc, -jnp.inf)
        se_sc[...] = jnp.zeros_like(se_sc)
        sx_sc[...] = jnp.zeros_like(sx_sc)
        xl_sc[...] = jnp.zeros_like(xl_sc)

    x = logits_ref[...].astype(jnp.float32)              # (TM, TV)

    # Online logsumexp update.
    local_max = jnp.max(x, axis=-1, keepdims=True)        # (TM, 1)
    m_new = jnp.maximum(m_sc[...], local_max)
    alpha = jnp.exp(m_sc[...] - m_new)
    se_sc[...] = alpha * se_sc[...] + jnp.sum(jnp.exp(x - m_new),
                                              axis=-1, keepdims=True)
    # Running sum of raw logits (for the smoothing term).
    sx_sc[...] = sx_sc[...] + jnp.sum(x, axis=-1, keepdims=True)

    # Logit at the label column: shift labels into tile-local coordinates
    # ((TM,1) scalar op) and compare against a per-tile lane iota.
    local_label = labels_ref[...] - k * tile_vocab         # (TM, 1) int32
    col = jax.lax.broadcasted_iota(jnp.int32, x.shape, 1)  # (TM, TV)
    onehot = col == local_label
    xl_sc[...] = xl_sc[...] + jnp.sum(jnp.where(onehot, x, 0.0),
                                      axis=-1, keepdims=True)
    m_sc[...] = m_new

    @pl.when(k == pl.num_programs(1) - 1)
    def _finalize():
        lse = m_sc[...] + jnp.log(se_sc[...])              # log-sum-exp (TM, 1)
        nll = lse - xl_sc[...]
        smooth = lse - sx_sc[...] * (1.0 / vocab_size)
        loss = nll * confidence + smooth * smoothing
        out_ref[...] = jnp.concatenate([loss, nll], axis=-1)   # (TM, 2)


def _pick_tiles(N, V, itemsize, target_block_bytes=4 << 20):
    """Pick (tile_rows, tile_vocab): ~target_block_bytes logits blocks,
    row tile a multiple of 8 dividing N, vocab tile a multiple of 128 dividing V."""
    tv = None
    if V % 128 == 0:
        cap = min(V, 2048)
        t = 128
        while t <= cap:
            if V % t == 0:
                tv = t
            t += 128
    if tv is None:
        tv = V  # ragged vocab: keep full width (block dim == array dim is legal)

    tm = None
    if N % 8 == 0:
        tm_cap = max(8, target_block_bytes // (tv * itemsize))
        t = 8
        while t <= min(N, tm_cap):
            if N % t == 0:
                tm = t
            t += 8
    if tm is None:
        tm = N
    return tm, tv


def smooth_cross_entropy_loss(logits, labels, *, smoothing=0.0,
                              reduction='mean', tile_rows=None,
                              tile_vocab=None):
    assert reduction in {'none', 'mean', 'sum'}
    confidence = 1.0 - smoothing

    *lead, V = logits.shape
    # Mirror torch: labels may already carry a trailing singleton class dim.
    if labels.ndim == logits.ndim:
        labels = labels.reshape(labels.shape[:-1])
    N = 1
    for d in lead:
        N *= d

    logits2d = logits.reshape(N, V)
    labels2d = labels.astype(jnp.int32).reshape(N, 1)

    auto_tm, auto_tv = _pick_tiles(N, V, jnp.dtype(logits.dtype).itemsize)
    tm = auto_tm if tile_rows is None else tile_rows
    tv = auto_tv if tile_vocab is None else tile_vocab
    assert N % tm == 0 and (tm % 8 == 0 or tm == N)
    assert V % tv == 0 and (tv % 128 == 0 or tv == V)

    kernel = functools.partial(_smooth_ce_kernel,
                               confidence=confidence, smoothing=smoothing,
                               vocab_size=V, tile_vocab=tv)

    out = pl.pallas_call(
        kernel,
        out_shape=jax.ShapeDtypeStruct((N, 2), jnp.float32),
        grid=(N // tm, V // tv),
        in_specs=[
            pl.BlockSpec((tm, tv), lambda i, k: (i, k)),
            pl.BlockSpec((tm, 1), lambda i, k: (i, 0)),
        ],
        out_specs=pl.BlockSpec((tm, 2), lambda i, k: (i, 0)),
        scratch_shapes=[
            pltpu.VMEM((tm, 1), jnp.float32),   # running max
            pltpu.VMEM((tm, 1), jnp.float32),   # running sum(exp)
            pltpu.VMEM((tm, 1), jnp.float32),   # running sum(x)
            pltpu.VMEM((tm, 1), jnp.float32),   # logit at label
        ],
        compiler_params=pltpu.CompilerParams(
            dimension_semantics=("parallel", "arbitrary"),
            vmem_limit_bytes=48 << 20),
    )(logits2d, labels2d)

    loss = out[:, 0]
    nll_loss = out[:, 1]

    if reduction == 'mean':
        return loss.mean(), nll_loss.mean()
    elif reduction == 'sum':
        return loss.sum(), nll_loss.sum()
    return loss.reshape(lead), nll_loss.reshape(lead)


def _reference(logits, labels, smoothing, reduction):
    lprobs = jax.nn.log_softmax(logits.astype(jnp.float32), axis=-1)
    nll = -jnp.take_along_axis(lprobs, labels[..., None].astype(jnp.int32),
                               axis=-1)[..., 0]
    smooth = -lprobs.mean(axis=-1)
    loss = nll * (1.0 - smoothing) + smooth * smoothing
    if reduction == 'mean':
        return loss.mean(), nll.mean()
    if reduction == 'sum':
        return loss.sum(), nll.sum()
    return loss, nll


if __name__ == "__main__":
    key = jax.random.PRNGKey(0)
    k1, k2 = jax.random.split(key)

    N, V = 16, 256
    smoothing = 0.1

    logits = jax.random.normal(k1, (N, V), dtype=jnp.float32)
    labels = jax.random.randint(k2, (N,), 0, V, dtype=jnp.int32)

    # Force a non-trivial (rows x vocab) grid at this small shape.
    loss, nll = smooth_cross_entropy_loss(
        logits, labels, smoothing=smoothing, reduction='mean',
        tile_rows=8, tile_vocab=128)
    jax.block_until_ready((loss, nll))
    loss_ref, nll_ref = _reference(logits, labels, smoothing, 'mean')
    assert jnp.allclose(loss, loss_ref, atol=1e-5, rtol=1e-5), (loss, loss_ref)
    assert jnp.allclose(nll, nll_ref, atol=1e-5, rtol=1e-5), (nll, nll_ref)

    # 'none' reduction, default tile picker, native-bf16 logits path.
    logits_bf16 = logits.astype(jnp.bfloat16)
    loss_n, nll_n = smooth_cross_entropy_loss(
        logits_bf16, labels, smoothing=smoothing, reduction='none')
    jax.block_until_ready((loss_n, nll_n))
    loss_nr, nll_nr = _reference(logits_bf16, labels, smoothing, 'none')
    assert jnp.allclose(loss_n, loss_nr, atol=1e-4, rtol=1e-4)
    assert jnp.allclose(nll_n, nll_nr, atol=1e-4, rtol=1e-4)

    # 3-D logits (batch, seq, vocab) flattened by the wrapper, 'sum' reduction.
    B, T = 2, 8
    logits3d = jax.random.normal(k1, (B, T, V), dtype=jnp.float32)
    labels3d = jax.random.randint(k2, (B, T), 0, V, dtype=jnp.int32)
    loss_s, nll_s = smooth_cross_entropy_loss(
        logits3d, labels3d, smoothing=smoothing, reduction='sum')
    jax.block_until_ready((loss_s, nll_s))
    loss_sr, nll_sr = _reference(logits3d, labels3d, smoothing, 'sum')
    assert jnp.allclose(loss_s, loss_sr, atol=1e-4, rtol=1e-5)
    assert jnp.allclose(nll_s, nll_sr, atol=1e-4, rtol=1e-5)

    print("KERNEL_OK")
</pallas_src>

<mosaic_0001>
module attributes {stable_mosaic.version = 11 : i64} {
  func.func @_smooth_ce_kernel(%arg0: i32, %arg1: i32, %arg2: memref<8x128xf32, #tpu.memory_space<vmem>>, %arg3: memref<8x1xi32, #tpu.memory_space<vmem>>, %arg4: memref<8x2xf32, #tpu.memory_space<vmem>>, %arg5: memref<8x1xf32, #tpu.memory_space<vmem>>, %arg6: memref<8x1xf32, #tpu.memory_space<vmem>>, %arg7: memref<8x1xf32, #tpu.memory_space<vmem>>, %arg8: memref<8x1xf32, #tpu.memory_space<vmem>>) attributes {dimension_semantics = [#tpu.dimension_semantics<parallel>, #tpu.dimension_semantics<arbitrary>], iteration_bounds = array<i64: 2, 2>, scalar_prefetch = 0 : i64, scratch_operands = 4 : i64, tpu.core_type = #tpu.core_type<tc>, window_params = [{transform_indices = @transform_0, window_bounds = array<i64: 8, 128>}, {transform_indices = @transform_1, window_bounds = array<i64: 8, 1>}, {transform_indices = @transform_2, window_bounds = array<i64: 8, 2>}]} {
    %c0_i32 = arith.constant 0 : i32
    %0 = arith.cmpi eq, %arg1, %c0_i32 : i32
    %1 = arith.extui %0 : i1 to i32
    %c0_i32_0 = arith.constant 0 : i32
    %2 = arith.cmpi ne, %1, %c0_i32_0 : i32
    scf.if %2 {
      %cst_27 = arith.constant 0xFF800000 : f32
      %43 = vector.broadcast %cst_27 : f32 to vector<8x1xf32>
      %c0_28 = arith.constant 0 : index
      %c0_29 = arith.constant 0 : index
      %44 = vector.load %arg5[%c0_28, %c0_29] : memref<8x1xf32, #tpu.memory_space<vmem>>, vector<8x1xf32>
      tpu.vector_store %arg5[%c0_28, %c0_29], %43 {strides = array<i32>} : memref<8x1xf32, #tpu.memory_space<vmem>>, vector<8x1xf32>,
      %cst_30 = arith.constant 0.000000e+00 : f32
      %45 = vector.broadcast %cst_30 : f32 to vector<8x1xf32>
      %c0_31 = arith.constant 0 : index
      %c0_32 = arith.constant 0 : index
      %46 = vector.load %arg6[%c0_31, %c0_32] : memref<8x1xf32, #tpu.memory_space<vmem>>, vector<8x1xf32>
      tpu.vector_store %arg6[%c0_31, %c0_32], %45 {strides = array<i32>} : memref<8x1xf32, #tpu.memory_space<vmem>>, vector<8x1xf32>,
      %cst_33 = arith.constant 0.000000e+00 : f32
      %47 = vector.broadcast %cst_33 : f32 to vector<8x1xf32>
      %c0_34 = arith.constant 0 : index
      %c0_35 = arith.constant 0 : index
      %48 = vector.load %arg7[%c0_34, %c0_35] : memref<8x1xf32, #tpu.memory_space<vmem>>, vector<8x1xf32>
      tpu.vector_store %arg7[%c0_34, %c0_35], %47 {strides = array<i32>} : memref<8x1xf32, #tpu.memory_space<vmem>>, vector<8x1xf32>,
      %cst_36 = arith.constant 0.000000e+00 : f32
      %49 = vector.broadcast %cst_36 : f32 to vector<8x1xf32>
      %c0_37 = arith.constant 0 : index
      %c0_38 = arith.constant 0 : index
      %50 = vector.load %arg8[%c0_37, %c0_38] : memref<8x1xf32, #tpu.memory_space<vmem>>, vector<8x1xf32>
      tpu.vector_store %arg8[%c0_37, %c0_38], %49 {strides = array<i32>} : memref<8x1xf32, #tpu.memory_space<vmem>>, vector<8x1xf32>,
    } else {
    }
    %c0 = arith.constant 0 : index
    %c0_1 = arith.constant 0 : index
    %3 = vector.load %arg2[%c0, %c0_1] : memref<8x128xf32, #tpu.memory_space<vmem>>, vector<8x128xf32>
    %cst = arith.constant dense<0xFF800000> : vector<8xf32>
    %4 = vector.multi_reduction <maximumf>, %3, %cst [1] : vector<8x128xf32> to vector<8xf32>
    %5 = vector.shape_cast %4 : vector<8xf32> to vector<8x1xf32>
    %c0_2 = arith.constant 0 : index
    %c0_3 = arith.constant 0 : index
    %6 = vector.load %arg5[%c0_2, %c0_3] : memref<8x1xf32, #tpu.memory_space<vmem>>, vector<8x1xf32>
    %7 = arith.maximumf %6, %5 : vector<8x1xf32>
    %c0_4 = arith.constant 0 : index
    %c0_5 = arith.constant 0 : index
    %8 = vector.load %arg5[%c0_4, %c0_5] : memref<8x1xf32, #tpu.memory_space<vmem>>, vector<8x1xf32>
    %9 = arith.subf %8, %7 : vector<8x1xf32>
    %10 = math.exp %9 : vector<8x1xf32>
    %c0_6 = arith.constant 0 : index
    %c0_7 = arith.constant 0 : index
    %11 = vector.load %arg6[%c0_6, %c0_7] : memref<8x1xf32, #tpu.memory_space<vmem>>, vector<8x1xf32>
    %12 = arith.mulf %10, %11 : vector<8x1xf32>
    %13 = vector.broadcast %7 : vector<8x1xf32> to vector<8x128xf32>
    %14 = arith.subf %3, %13 : vector<8x128xf32>
    %15 = math.exp %14 : vector<8x128xf32>
    %cst_8 = arith.constant dense<0.000000e+00> : vector<8xf32>
    %16 = vector.multi_reduction <add>, %15, %cst_8 [1] : vector<8x128xf32> to vector<8xf32>
    %17 = vector.shape_cast %16 : vector<8xf32> to vector<8x1xf32>
    %18 = arith.addf %12, %17 : vector<8x1xf32>
    %c0_9 = arith.constant 0 : index
    %c0_10 = arith.constant 0 : index
    %19 = vector.load %arg6[%c0_9, %c0_10] : memref<8x1xf32, #tpu.memory_space<vmem>>, vector<8x1xf32>
    tpu.vector_store %arg6[%c0_9, %c0_10], %18 {strides = array<i32>} : memref<8x1xf32, #tpu.memory_space<vmem>>, vector<8x1xf32>,
    %c0_11 = arith.constant 0 : index
    %c0_12 = arith.constant 0 : index
    %20 = vector.load %arg7[%c0_11, %c0_12] : memref<8x1xf32, #tpu.memory_space<vmem>>, vector<8x1xf32>
    %cst_13 = arith.constant dense<0.000000e+00> : vector<8xf32>
    %21 = vector.multi_reduction <add>, %3, %cst_13 [1] : vector<8x128xf32> to vector<8xf32>
    %22 = vector.shape_cast %21 : vector<8xf32> to vector<8x1xf32>
    %23 = arith.addf %20, %22 : vector<8x1xf32>
    %c0_14 = arith.constant 0 : index
    %c0_15 = arith.constant 0 : index
    %24 = vector.load %arg7[%c0_14, %c0_15] : memref<8x1xf32, #tpu.memory_space<vmem>>, vector<8x1xf32>
    tpu.vector_store %arg7[%c0_14, %c0_15], %23 {strides = array<i32>} : memref<8x1xf32, #tpu.memory_space<vmem>>, vector<8x1xf32>,
    %c0_16 = arith.constant 0 : index
    %c0_17 = arith.constant 0 : index
    %25 = vector.load %arg3[%c0_16, %c0_17] : memref<8x1xi32, #tpu.memory_space<vmem>>, vector<8x1xi32>
    %c128_i32 = arith.constant 128 : i32
    %26 = arith.muli %arg1, %c128_i32 : i32
    %27 = vector.broadcast %26 : i32 to vector<8x1xi32>
    %28 = arith.subi %25, %27 : vector<8x1xi32>
    %29 = tpu.iota {dimensions = array<i32: 1>} : vector<8x128xi32>
    %30 = vector.broadcast %28 : vector<8x1xi32> to vector<8x128xi32>
    %31 = arith.cmpi eq, %29, %30 : vector<8x128xi32>
    %c0_18 = arith.constant 0 : index
    %c0_19 = arith.constant 0 : index
    %32 = vector.load %arg8[%c0_18, %c0_19] : memref<8x1xf32, #tpu.memory_space<vmem>>, vector<8x1xf32>
    %cst_20 = arith.constant 0.000000e+00 : f32
    %33 = vector.broadcast %cst_20 : f32 to vector<8x128xf32>
    %34 = arith.select %31, %3, %33 : vector<8x128xi1>, vector<8x128xf32>
    %cst_21 = arith.constant dense<0.000000e+00> : vector<8xf32>
    %35 = vector.multi_reduction <add>, %34, %cst_21 [1] : vector<8x128xf32> to vector<8xf32>
    %36 = vector.shape_cast %35 : vector<8xf32> to vector<8x1xf32>
    %37 = arith.addf %32, %36 : vector<8x1xf32>
    %c0_22 = arith.constant 0 : index
    %c0_23 = arith.constant 0 : index
    %38 = vector.load %arg8[%c0_22, %c0_23] : memref<8x1xf32, #tpu.memory_space<vmem>>, vector<8x1xf32>
    tpu.vector_store %arg8[%c0_22, %c0_23], %37 {strides = array<i32>} : memref<8x1xf32, #tpu.memory_space<vmem>>, vector<8x1xf32>,
    %c0_24 = arith.constant 0 : index
    %c0_25 = arith.constant 0 : index
    %39 = vector.load %arg5[%c0_24, %c0_25] : memref<8x1xf32, #tpu.memory_space<vmem>>, vector<8x1xf32>
    tpu.vector_store %arg5[%c0_24, %c0_25], %7 {strides = array<i32>} : memref<8x1xf32, #tpu.memory_space<vmem>>, vector<8x1xf32>,
    %c1_i32 = arith.constant 1 : i32
    %40 = arith.cmpi eq, %arg1, %c1_i32 : i32
    %41 = arith.extui %40 : i1 to i32
    %c0_i32_26 = arith.constant 0 : i32
    %42 = arith.cmpi ne, %41, %c0_i32_26 : i32
    scf.if %42 {
      %c0_27 = arith.constant 0 : index
      %c0_28 = arith.constant 0 : index
      %43 = vector.load %arg5[%c0_27, %c0_28] : memref<8x1xf32, #tpu.memory_space<vmem>>, vector<8x1xf32>
      %c0_29 = arith.constant 0 : index
      %c0_30 = arith.constant 0 : index
      %44 = vector.load %arg6[%c0_29, %c0_30] : memref<8x1xf32, #tpu.memory_space<vmem>>, vector<8x1xf32>
      %45 = math.log %44 : vector<8x1xf32>
      %46 = arith.addf %43, %45 : vector<8x1xf32>
      %c0_31 = arith.constant 0 : index
      %c0_32 = arith.constant 0 : index
      %47 = vector.load %arg8[%c0_31, %c0_32] : memref<8x1xf32, #tpu.memory_space<vmem>>, vector<8x1xf32>
      %48 = arith.subf %46, %47 : vector<8x1xf32>
      %c0_33 = arith.constant 0 : index
      %c0_34 = arith.constant 0 : index
      %49 = vector.load %arg7[%c0_33, %c0_34] : memref<8x1xf32, #tpu.memory_space<vmem>>, vector<8x1xf32>
      %cst_35 = arith.constant 3.906250e-03 : f32
      %50 = vector.broadcast %cst_35 : f32 to vector<8x1xf32>
      %51 = arith.mulf %49, %50 : vector<8x1xf32>
      %52 = arith.subf %46, %51 : vector<8x1xf32>
      %cst_36 = arith.constant 0.899999976 : f32
      %53 = vector.broadcast %cst_36 : f32 to vector<8x1xf32>
      %54 = arith.mulf %48, %53 : vector<8x1xf32>
      %cst_37 = arith.constant 1.000000e-01 : f32
      %55 = vector.broadcast %cst_37 : f32 to vector<8x1xf32>
      %56 = arith.mulf %52, %55 : vector<8x1xf32>
      %57 = arith.addf %54, %56 : vector<8x1xf32>
      %58 = tpu.concatenate %57, %48 in 1 : vector<8x1xf32>, vector<8x1xf32> -> vector<8x2xf32>
      %c0_38 = arith.constant 0 : index
      %c0_39 = arith.constant 0 : index
      %59 = vector.load %arg4[%c0_38, %c0_39] : memref<8x2xf32, #tpu.memory_space<vmem>>, vector<8x2xf32>
      tpu.vector_store %arg4[%c0_38, %c0_39], %58 {strides = array<i32>} : memref<8x2xf32, #tpu.memory_space<vmem>>, vector<8x2xf32>,
    } else {
    }
    return
  }
  func.func @transform_0(%arg0: i32, %arg1: i32) -> (i32, i32) {
    %c0_i32 = arith.constant 0 : i32
    return %arg0, %arg1 : i32, i32
  }
  func.func @transform_1(%arg0: i32, %arg1: i32) -> (i32, i32) {
    %c0_i32 = arith.constant 0 : i32
    %c0_i32_0 = arith.constant 0 : i32
    return %arg0, %c0_i32 : i32, i32
  }
  func.func @transform_2(%arg0: i32, %arg1: i32) -> (i32, i32) {
    %c0_i32 = arith.constant 0 : i32
    %c0_i32_0 = arith.constant 0 : i32
    return %arg0, %c0_i32 : i32, i32
  }
}

</mosaic_0001>

<bundles_post_ra>
// kernel: tpu_custom_call.1
= control target key start
LH: loop header
LB: loop body
LE: loop exit
PB: predicated region body
PF: predicated region fallthrough
CT: control target
= control target key end

     0   :  { %7 = vsyncpa [#allocation7], 0  ;;  %s741_s0 = inlined_call_operand.hbm [shape: f32[16,256], index: 0, kind: input, shape index: {}]   ;;  %s742_s1 = inlined_call_operand.vmem [shape: s32[16,1], index: 1, kind: input, shape index: {}]   ;;  %s743_s2 = inlined_call_operand.vmem [shape: f32[16,2], index: 2, kind: output, shape index: {}]  }
   0x1   :  { %9 = vsyncpa [#allocation7 + $0x1], 0  ;;  %s577_s9 = smov 0   ;;  %s579_s10 = smov 0  }
   0x2   :  { %s581_s11 = smov 0   ;;  %s583_s12 = smov 0  }
   0x3   :  { %s585_s13 = smov 0   ;;  %s587_s14 = smov 0  }
   0x4   :  { %s589_s15 = smov 0   ;;  %s591_s16 = smov 0  }
   0x5 LB: > { %s360_s17 = sadd.s32 4294967295, %s555_s16   ;;  %s24_s18 = sadd.s32 1, %s547_s14  ;;  %s555_s16 = sphi %s591_s16, %s15_s16   ;;  %s551_s15 = sphi %s589_s15, %s755_s15   ;;  %s547_s14 = sphi %s587_s14, %s754_s14   ;;  %s543_s13 = sphi %s585_s13, %s753_s13   ;;  %s539_s12 = sphi %s583_s12, %s752_s12   ;;  %s535_s11 = sphi %s581_s11, %s751_s11   ;;  %s531_s10 = sphi %s579_s10, %s750_s10   ;;  %s527_s9 = sphi %s577_s9, %s749_s9  }
   0x6   : > { %p25_p0 = scmp.ge.s32.totalorder %s24_s18, 2  ;;  %s27_s19 = sadd.s32 1, %s551_s15 }
   0x7   : > { %s36_s20 = sadd.s32 1, %s535_s11  ;;  %p43_p1 = scmp.ne.s32.totalorder %s535_s11, %s531_s10 }
   0x8   : > { %s757_s18 = smov (%p25_p0, %s24_s18), 0  ;;  %s759_s19 = smov (!%p25_p0, %s27_s19), %s551_s15 }
   0x9   : > { %s32_s21 = ssub.s32 %s547_s14, %s757_s18  ;;  %p44_p2 = scmp.eq.s32.totalorder %s555_s16, 0 }
   0xa   : > { %p29_p3 = scmp.ge.s32.totalorder %s759_s19, 2  ;;  %p49_p4 = scmp.ne.s32.totalorder %s531_s10, %s527_s9 }
   0xb   : > { %p628_p5 = por %p44_p2, %p43_p1  ;;  %p50_p6 = scmp.eq.s32.totalorder %s360_s17, 0 }
   0xc   : > { %s761_s19 = smov (%p29_p3, %s759_s19), 0  ;;  %p382_p8 = scmp.lt.s32.totalorder %s555_s16, 4 }
   0xd   : > { %p634_p7 = por %p50_p6, %p49_p4  ;;  %s31_s24 = ssub.s32 %s551_s15, %s761_s19 }
   0xe   : > { %s33_s25 = sor.u32 %s32_s21, %s31_s24  ;;  %s125_s26 = sand.u32 1, %s535_s11  }
   0xf   : > { %p34_p9 = scmp.eq.s32.totalorder %s33_s25, 0  ;;  %s364_s27 = sshll.u32 %s125_s26, 3 }
  0x10   : > { %s365_s28 = sshll.u32 %s551_s15, 1  ;;  %s129_s4 = scalar_lea.vmem [#allocation6], %s364_s27 }
  0x11   : > { %s644_s29 = scalar_select %p34_p9, %s535_s11, %s36_s20  }
  0x12   : > { %s134_s30 = sadd.s32 %s547_s14, %s365_s28  ;;  %s138_s5 = sshll.u32 %s129_s4, 4  ;;  %s652_s5 = int_to_ptr.vmem [resolvable:$true] %s138_s5 }
  0x13   : > { %s366_s3 = sshll.u32 %s134_s30, 7  ;;  %p658_p10 = pnand %p382_p8, %p628_p5 }
  0x14   : > { %s650_s8 = scalar_lea.hbm %s741_s0, %s366_s3  ;;  %s126_s17 = scalar_lea.sflag [#allocation7], %s125_s26 }
  0x15   : > { %s459_s20 = scalar_lea.hbm %s650_s8, 128  ;;  %p461_p0 = pneg %p658_p10 }
  0x16   : > { %p460_p13 = scmp.ne.s32.totalorder %s650_s8, %s459_s20  ;;  %s464_s24 = scalar_lea.hbm %s741_s0, 512 }
  0x17   : > { %p465_p3 = scmp.lt.u32.totalorder %s650_s8, %s741_s0  ;;  %p466_p4 = scmp.lt.u32.totalorder %s464_s24, %s459_s20 }
  0x18   : > { %p462_p1 = pnand %p461_p0, %p460_p13  ;;  %p468_p6 = scmp.lt.u32.totalorder %s459_s20, %s650_s8 }
  0x19   : > { %p467_p5 = por %p466_p4, %p465_p3 }
  0x1a   : > { %p463_p2 = pneg %p462_p1 }
  0x1b   : > { %p469_p8 = por %p468_p6, %p467_p5 }
  0x1d   : > { %p470_p9 = pnand %p469_p8, %p463_p2 }
  0x1f   : > { %473 = shalt.err (!%p470_p9)
}
  0x20   : > { %s474_s26 = scalar_lea.vmem %s652_s5, 128  ;;  %s557_s28 = smov [#allocation6]  }
  0x21   : > { %p475_p13 = scmp.ne.s32.totalorder %s652_s5, %s474_s26  ;;  %s479_s30 = sshll.u32 %s557_s28, 4  ;;  %s480_s30 = int_to_ptr.vmem [resolvable:$false] %s479_s30 }
  0x22   : > { %s481_s3 = scalar_lea.vmem %s480_s30, 256  ;;  %p482_p12 = scmp.lt.s32.totalorder %s652_s5, %s480_s30 }
  0x23   : > { %p477_p1 = pnand %p475_p13, %p461_p0  ;;  %p483_p3 = scmp.lt.s32.totalorder %s481_s3, %s474_s26 }
  0x25   : > { %p478_p11 = pneg %p477_p1  ;;  %p484_p4 = por %p483_p3, %p482_p12 }
  0x27   : > { %p485_p5 = pnand %p484_p4, %p478_p11 }
  0x29   : > { %488 = shalt.err (!%p485_p5)
}
  0x2a   : > { %381 = dma.hbm_to_vmem [thread:$0]  (!%p658_p10), %s650_s8, 128, %s652_s5, %s126_s17  }
  0x2b   : > { %p747_p2 = scmp.lt.s32.totalorder %s555_s16, 5  ;;  %p748_p6 = scmp.ge.s32.totalorder %s555_s16, 1 }
  0x2d   : > { %p151_p0 = pnand %p748_p6, %p747_p2 }
  0x2e   : > { %s156_s4 = sand.u32 (!%p151_p0), 1, %s531_s10  }
  0x2f   : > { %154 = sbr.rel (%p151_p0) target bundleno = 638 (0x27e), region = 28  ;;  %s368_s6 = sshll.u32 (!%p151_p0), %s156_s4, 3 }
  0x30   : > { %s157_s7 = scalar_lea.sflag (!%p151_p0), [#allocation7], %s156_s4  ;;  %s160_s20 = scalar_lea.vmem (!%p151_p0), [#allocation6], %s368_s6 }
  0x36   : > { %522 = dma.done.wait (%p634_p7), %s157_s7, 128  }
  0x37   : > { %524 = vsyncadd (%p634_p7), %s157_s7, 4294967168  ;;  %p184_p11 = scmp.lt.s32.totalorder %s543_s13, 1  ;;  %p371_p10 = scmp.ne.s32.totalorder %s539_s12, 0 }
  0x38   : > { %vm196_vm0 = vcmask (!%p371_p10), 7168   ;;  %v558_v0 = vmov (!%p371_p10), -inf   ;;  %v559_v1 = vmov (!%p371_p10), 0.0  }
  0x39   : > { %s763_s13 = smov (!%p184_p11, %s543_s13), 1  ;;  %195 = sbr.rel (%p371_p10) target bundleno = 64 (0x40), region = 36 }
  0x3a   : > { %s369_s5 = sshll.u32 %s763_s13, 3  ;;  %197 = vst.msk [vmem:[#allocation2] sm:$0xff] (!%p371_p10), %vm196_vm0, %v558_v0  ;;  %198 = vst.msk [vmem:[#allocation3] sm:$0xff] (!%p371_p10), %vm196_vm0, %v559_v1 }
  0x3b   : > { %s187_s17 = scalar_lea.vmem %s742_s1, %s369_s5  ;;  %s706_s24 = scalar_lea.vmem %s743_s2, %s369_s5  ;;  %199 = vst.msk [vmem:[#allocation4] sm:$0xff] (!%p371_p10), %vm196_vm0, %v559_v1  ;;  %200 = vst.msk [vmem:[#allocation5] sm:$0xff] (!%p371_p10), %vm196_vm0, %v559_v1 }
  0x40 PF: > { %v201_v2 = vld [vmem:[%s160_s20] sm:$0xff]  ;;  %v560_v3 = vmov 0   ;;  %s372_s13 = sshll.u32 %s539_s12, 7  ;;  %vm222_vm1 = vcmask 7168   ;;  %v233_v18 = vlaneseq  ;;  %p373_p7 = scmp.ne.s32.totalorder %s539_s12, 1 }
  0x41   : > { %202 = vmax.xlane.f32.xlu0 %v201_v2  ;;  %452 = vset.pattern.permute.xlu1 %v560_v3  ;;  %v229_v4 = vld [vmem:[%s187_s17] sm:$0xff]  ;;  %v231_v5 = vstv %s372_s13  ;;  %v209_v24 = vld [vmem:[#allocation3] sm:$0xff]  ;;  %s561_s23 = smov (!%p373_p7), 1   ;;  %vm268_vm3 = vcmask (!%p373_p7), 15360  }
  0x42   : > { %451 = vset.pattern.permute.xlu0 %v560_v3  ;;  %v232_v6 = vsub.s32 %v229_v4, %v231_v5  ;;  %v204_v7 = vld [vmem:[#allocation2] sm:$0xff]  ;;  %v224_v12 = vld [vmem:[#allocation4] sm:$0xff]  ;;  %v234_v19 = vand.u32 127, %v233_v18  ;;  %v239_v28 = vld [vmem:[#allocation5] sm:$0xff] }
  0x44   : > { %236 = vperm.xlu1 %452, %v232_v6  }
  0x68   : > { %225 = vadd.xlane.f32.xlu1 %v201_v2 }
  0xc3   : > { %v237_v11 = vpop.permute.xlu1 %236 }
  0xc4   : > { %vm238_vm2 = vcmp.eq.s32.totalorder %v234_v19, %v237_v11 }
  0xc5   : > { %v240_v21 = vsel %vm238_vm2, %v201_v2, 0.0 }
  0xce   : > { %v203_v8 = vpop.xlane.xlu0 %202 }
  0xcf   : > { %v205_v9 = vmax.f32 %v204_v7, %v203_v8 }
  0xd1   : > { %v206_v10 = vsub.f32 %v204_v7, %v205_v9  ;;  %245 = vst.msk [vmem:[#allocation2] sm:$0xff] %vm222_vm1, %v205_v9  ;;  %213 = vperm.xlu0 %451, %v205_v9  }
  0xd3   : > { %v207_v22 = vmul.f32 1.442695, %v206_v10 }
  0xd8   : > { %v250_v34 = vld [vmem:[#allocation2] sm:$0xff] (!%p373_p7) }
  0xf5   : > { %v226_v13 = vpop.xlane.xlu1 %225 }
  0xf6   : > { %v227_v14 = vadd.f32 %v226_v13, %v224_v12 }
  0xf8   : > { %228 = vst.msk [vmem:[#allocation4] sm:$0xff] %vm222_vm1, %v227_v14 }
  0xff   : > { %v257_v32 = vld [vmem:[#allocation4] sm:$0xff] (!%p373_p7) }
 0x100   : > { %v258_v36 = vmul.f32 (!%p373_p7), 0.00390625, %v257_v32 }
 0x150   : > { %v214_v15 = vpop.permute.xlu0 %213 }
 0x151   : > { %v216_v16 = vsub.f32 %v201_v2, %v214_v15 }
 0x153   : > { %v217_v17 = vmul.f32 1.442695, %v216_v16 }
 0x155   : > { %453 = vpow2.f32 %v217_v17 }
 0x156   : > { %455 = vpow2.f32 %v207_v22 }
 0x15f   : > { %v454_v20 = vpop.eup %453 }
 0x160   : > { %219 = vadd.xlane.f32.xlu1 %v454_v20  ;;  %v456_v23 = vpop.eup %455 }
 0x161   : > { %v210_v25 = vmul.f32 %v456_v23, %v209_v24 }
 0x164   : > { %241 = vadd.xlane.f32.xlu1 %v240_v21 }
 0x1ed   : > { %v220_v26 = vpop.xlane.xlu1 %219 }
 0x1ee   : > { %v221_v27 = vadd.f32 %v220_v26, %v210_v25  ;;  %249 = sbr.rel (%p373_p7) target bundleno = 638 (0x27e), region = 40 }
 0x1f0   : > { %223 = vst.msk [vmem:[#allocation3] sm:$0xff] %vm222_vm1, %v221_v27 }
 0x1f1   : > { %v242_v29 = vpop.xlane.xlu1 %241 }
 0x1f2   : > { %v243_v30 = vadd.f32 %v242_v29, %v239_v28 }
 0x1f4   : > { %244 = vst.msk [vmem:[#allocation5] sm:$0xff] %vm222_vm1, %v243_v30 }
 0x1f7   : > { %v251_v31 = vld [vmem:[#allocation3] sm:$0xff] }
 0x1f8   : > { %457 = vlog2.f32 %v251_v31 }
 0x1fb   : > { %v255_v37 = vld [vmem:[#allocation5] sm:$0xff] }
 0x202   : > { %v458_v33 = vpop.eup %457 }
 0x203   : > { %v253_v35 = vmul.f32 0.6931472, %v458_v33 }
 0x205   : > { %v254_v38 = vadd.f32 %v253_v35, %v250_v34 }
 0x207   : > { %v256_v39 = vsub.f32 %v254_v38, %v255_v37  ;;  %v259_v40 = vsub.f32 %v254_v38, %v258_v36 }
 0x209   : > { %v260_v41 = vmul.f32 0.9, %v256_v39  ;;  %264 = vrot.lane.b32.xlu0 %v256_v39, %s561_s23  ;;  %v261_v42 = vmul.f32 0.1, %v259_v40 }
 0x20b   : > { %v262_v43 = vadd.f32 %v261_v42, %v260_v41 }
 0x27b   : > { %v265_v44 = vpop.permute.xlu0 %264 }
 0x27c   : > { %v267_v45 = vsel %vm222_vm1, %v262_v43, %v265_v44 }
 0x27d   : > { %269 = vst.msk [vmem:[%s706_s24] sm:$0xff] %vm268_vm3, %v267_v45 }
 0x27e PF: > { %s15_s16 = sadd.s32 1, %s555_s16   ;;  %s749_s9 = smov %s531_s10 }
 0x27f   : > { %p12_p12 = scmp.ge.s32.totalorder %s15_s16, 6   ;;  %s750_s10 = smov %s535_s11 }
 0x280   : > { %s751_s11 = smov %s644_s29  ;;  %s752_s12 = smov %s547_s14 }
 0x281   : > { %s753_s13 = smov %s551_s15  ;;  %s754_s14 = smov %s757_s18 }
 0x282   : > { %s755_s15 = smov %s761_s19  ;;  %14 = sbr.rel (!%p12_p12) target bundleno = 5 (0x5), region = 79 }
 0x289   :  { %289 = vsyncpa [#allocation7], 1 }
 0x28a   :  { %291 = vsyncpa [#allocation7 + $0x1], 1 }

</bundles_post_ra>
